<compile_context>
chip_gen: v7x
topology: tpu7x:2x2x1
jax: 0.10.0
libtpu: 0.0.40
codegen_flags: <defaults>
</compile_context>

<pallas_src>
import jax
import jax.numpy as jnp
from jax.experimental import pallas as pl
from jax.experimental.pallas import tpu as pltpu

_FAST_PATH_TABLE_BYTES = 8 * 1024 * 1024  # table resident in VMEM below this


def _round_up(x, m):
    return ((x + m - 1) // m) * m


# ---------------------------------------------------------------------------
# Small-vocab fast path: table resident in VMEM, MXU one-hot gather.
# ---------------------------------------------------------------------------
def _choose_row_tile(n):
    """Rows per grid step (multiple of 8); keep >=2 tiles for v7x megacore."""
    if n <= 8:
        return 8
    if n <= 256:
        return max(8, _round_up(n, 16) // 2)
    return 256


def _make_fast_kernel(tile_rows, vocab):
    T, V = tile_rows, vocab

    def kernel(tok_ref, tgt_ref, table_ref, logits_ref, loss_ref):
        # tok_ref/tgt_ref: (T, 1) int32; table_ref: (V, V) resident in VMEM.
        tok = tok_ref[...]
        tgt = tgt_ref[...]
        tbl = table_ref[...]
        col = jax.lax.broadcasted_iota(jnp.int32, (T, V), 1)

        # Row gather as one-hot @ table on the MXU.  HIGHEST precision keeps
        # the gathered rows bit-accurate enough for f32 logits.
        one_hot = (col == tok).astype(tbl.dtype)
        rows = jnp.dot(one_hot, tbl,
                       precision=jax.lax.Precision.HIGHEST,
                       preferred_element_type=jnp.float32)          # (T, V)
        logits_ref[...] = rows.astype(logits_ref.dtype)

        # Numerically-stable log-sum-exp + target logit (no second one-hot).
        m = jnp.max(rows, axis=-1, keepdims=True)
        lse = jnp.log(jnp.sum(jnp.exp(rows - m), axis=-1, keepdims=True)) + m
        tgt_logit = jnp.sum(jnp.where(col == tgt, rows, 0.0),
                            axis=-1, keepdims=True)
        loss_ref[...] = (lse - tgt_logit).astype(loss_ref.dtype)     # (T, 1)

    return kernel


def _forward_small_vocab(tok, tgt, table):
    (n,) = tok.shape
    v, c = table.shape
    t = _choose_row_tile(n)
    n_pad = _round_up(n, t)
    tok_p = jnp.pad(tok, (0, n_pad - n)).reshape(n_pad, 1)
    tgt_p = jnp.pad(tgt, (0, n_pad - n)).reshape(n_pad, 1)

    logits, loss_rows = pl.pallas_call(
        _make_fast_kernel(t, c),
        out_shape=(
            jax.ShapeDtypeStruct((n_pad, c), table.dtype),
            jax.ShapeDtypeStruct((n_pad, 1), jnp.float32),
        ),
        grid=(n_pad // t,),
        in_specs=[
            pl.BlockSpec((t, 1), lambda i: (i, 0)),     # tokens
            pl.BlockSpec((t, 1), lambda i: (i, 0)),     # targets
            pl.BlockSpec((v, c), lambda i: (0, 0)),     # full table, resident
        ],
        out_specs=(
            pl.BlockSpec((t, c), lambda i: (i, 0)),     # logits (pipelined out)
            pl.BlockSpec((t, 1), lambda i: (i, 0)),     # per-row loss
        ),
        compiler_params=pltpu.CompilerParams(dimension_semantics=("parallel",)),
    )(tok_p, tgt_p, table)
    return logits, loss_rows


# ---------------------------------------------------------------------------
# Large-vocab path: batched manual double-buffered DMA row gather from HBM.
# ---------------------------------------------------------------------------
def _choose_gather_rows(n, embed_dim, itemsize):
    # rowbuf (2x) + double-buffered logits out block ~= 4 * R * C * itemsize.
    budget = 16 * 1024 * 1024
    r = budget // (4 * embed_dim * itemsize)
    r = max(8, min(32, (r // 8) * 8))
    return min(r, _round_up(n, 8))


def _make_gather_kernel(rows_per_step, embed_dim):
    R, C = rows_per_step, embed_dim

    def kernel(tok_smem, tgt_ref, table_hbm, logits_ref, loss_ref,
               rowbuf, copy_sems):
        # tok_smem: (N_pad,) int32 scalar-prefetch (SMEM) -> DMA row indices.
        # table_hbm: (V, C) ref left in HBM (memory_space=pl.ANY).
        # rowbuf: (2, R, C) VMEM double buffer; copy_sems: (2, R) DMA sems.
        s = pl.program_id(0)
        nsteps = pl.num_programs(0)

        def start_fetch(step, slot):
            base = step * R
            for r in range(R):
                pltpu.make_async_copy(
                    table_hbm.at[pl.ds(tok_smem[base + r], 1)],   # (1, C) row
                    rowbuf.at[slot, pl.ds(r, 1)],
                    copy_sems.at[slot, r],
                ).start()

        @pl.when(s == 0)
        def _():
            start_fetch(0, 0)

        slot = s % 2
        # Wait for this step's R row DMAs.
        for r in range(R):
            pltpu.make_async_copy(
                table_hbm.at[pl.ds(0, 1)],
                rowbuf.at[slot, pl.ds(r, 1)],
                copy_sems.at[slot, r],
            ).wait()

        # Prefetch next step's rows into the other buffer while we compute.
        @pl.when(s + 1 < nsteps)
        def _():
            start_fetch(s + 1, 1 - slot)

        rows = rowbuf[slot].astype(jnp.float32)                   # (R, C)
        logits_ref[...] = rows.astype(logits_ref.dtype)

        m = jnp.max(rows, axis=-1, keepdims=True)
        lse = jnp.log(jnp.sum(jnp.exp(rows - m), axis=-1, keepdims=True)) + m
        col = jax.lax.broadcasted_iota(jnp.int32, (R, C), 1)
        tgt = tgt_ref[...]                                        # (R, 1)
        tgt_logit = jnp.sum(jnp.where(col == tgt, rows, 0.0),
                            axis=-1, keepdims=True)
        loss_ref[...] = lse - tgt_logit

    return kernel


def _forward_large_vocab(tok, tgt, table):
    (n,) = tok.shape
    v, c = table.shape
    r = _choose_gather_rows(n, c, table.dtype.itemsize)
    n_pad = _round_up(n, r)
    tok_p = jnp.pad(tok, (0, n_pad - n))
    tgt_p = jnp.pad(tgt, (0, n_pad - n)).reshape(n_pad, 1)

    grid_spec = pltpu.PrefetchScalarGridSpec(
        num_scalar_prefetch=1,
        grid=(n_pad // r,),
        in_specs=[
            pl.BlockSpec((r, 1), lambda s, tok: (s, 0)),   # targets (VMEM)
            pl.BlockSpec(memory_space=pl.ANY),             # table stays in HBM
        ],
        out_specs=(
            pl.BlockSpec((r, c), lambda s, tok: (s, 0)),   # logits block/step
            pl.BlockSpec((r, 1), lambda s, tok: (s, 0)),   # per-row loss
        ),
        scratch_shapes=[
            pltpu.VMEM((2, r, c), table.dtype),
            pltpu.SemaphoreType.DMA((2, r)),
        ],
    )
    logits, loss_rows = pl.pallas_call(
        _make_gather_kernel(r, c),
        out_shape=(
            jax.ShapeDtypeStruct((n_pad, c), table.dtype),
            jax.ShapeDtypeStruct((n_pad, 1), jnp.float32),
        ),
        grid_spec=grid_spec,
        compiler_params=pltpu.CompilerParams(dimension_semantics=("arbitrary",)),
    )(tok_p, tgt_p, table)
    return logits, loss_rows


# ---------------------------------------------------------------------------
# Public wrapper == BigramModel.forward(input_b_l, target_b_l)
# ---------------------------------------------------------------------------
def bigram_forward(input_b_l, target_b_l, table, *, force_gather_path=False):
    B, L = input_b_l.shape
    v = table.shape[0]
    n = B * L
    # Clamp ids: token ids >= V would otherwise drive an unchecked OOB DMA.
    tok = jnp.clip(input_b_l.reshape(n).astype(jnp.int32), 0, v - 1)
    tgt = jnp.clip(target_b_l.reshape(n).astype(jnp.int32), 0, v - 1)

    table_bytes = table.size * table.dtype.itemsize
    if force_gather_path or table_bytes > _FAST_PATH_TABLE_BYTES:
        logits_pad, loss_rows = _forward_large_vocab(tok, tgt, table)
    else:
        logits_pad, loss_rows = _forward_small_vocab(tok, tgt, table)

    logits = logits_pad[:n]                      # drop padded rows
    loss = jnp.sum(loss_rows[:n, 0]) / n         # mean cross-entropy
    return logits, loss


if __name__ == "__main__":
    VOCAB = 128   # vocab_size; also the embedding dim (nn.Embedding(vocab, vocab))
    B, L = 2, 8

    key = jax.random.PRNGKey(0)
    k_tab, k_in, k_tgt = jax.random.split(key, 3)

    # nn.Embedding default init ~ N(0, 1)
    table = jax.random.normal(k_tab, (VOCAB, VOCAB), dtype=jnp.float32)
    input_b_l = jax.random.randint(k_in, (B, L), 0, VOCAB, dtype=jnp.int32)
    target_b_l = jax.random.randint(k_tgt, (B, L), 0, VOCAB, dtype=jnp.int32)

    # Pure-JAX reference.
    ref_logits = table[input_b_l.reshape(-1)]
    ref_ls = jax.nn.log_softmax(ref_logits, axis=-1)
    ref_loss = -jnp.mean(ref_ls[jnp.arange(B * L), target_b_l.reshape(-1)])

    # Fast path (table resident in VMEM).
    logits, loss = bigram_forward(input_b_l, target_b_l, table)
    jax.block_until_ready((logits, loss))
    assert logits.shape == (B * L, VOCAB)
    assert jnp.allclose(logits, ref_logits, atol=1e-5, rtol=1e-5)
    assert jnp.allclose(loss, ref_loss, atol=1e-5, rtol=1e-5)

    # Also exercise the large-vocab path (batched double-buffered DMA gather).
    logits_g, loss_g = bigram_forward(input_b_l, target_b_l, table,
                                      force_gather_path=True)
    jax.block_until_ready((logits_g, loss_g))
    assert jnp.allclose(logits_g, ref_logits, atol=1e-5, rtol=1e-5)
    assert jnp.allclose(loss_g, ref_loss, atol=1e-5, rtol=1e-5)

    # TODO(synk): generate() (autoregressive torch.multinomial sampling loop) is
    # host-side control flow; only the forward hot path is implemented as kernels.
    print("KERNEL_OK")
</pallas_src>

<mosaic_0001>
module attributes {stable_mosaic.version = 11 : i64} {
  func.func @kernel(%arg0: i32, %arg1: memref<8x1xi32, #tpu.memory_space<vmem>>, %arg2: memref<8x1xi32, #tpu.memory_space<vmem>>, %arg3: memref<128x128xf32, #tpu.memory_space<vmem>>, %arg4: memref<8x128xf32, #tpu.memory_space<vmem>>, %arg5: memref<8x1xf32, #tpu.memory_space<vmem>>) attributes {dimension_semantics = [#tpu.dimension_semantics<parallel>], iteration_bounds = array<i64: 2>, scalar_prefetch = 0 : i64, scratch_operands = 0 : i64, tpu.core_type = #tpu.core_type<tc>, window_params = [{transform_indices = @transform_0, window_bounds = array<i64: 8, 1>}, {transform_indices = @transform_1, window_bounds = array<i64: 8, 1>}, {pipeline_mode = #tpu.pipeline_mode<synchronous>, transform_indices = @transform_2, window_bounds = array<i64: 128, 128>}, {transform_indices = @transform_3, window_bounds = array<i64: 8, 128>}, {transform_indices = @transform_4, window_bounds = array<i64: 8, 1>}]} {
    %c0 = arith.constant 0 : index
    %c0_0 = arith.constant 0 : index
    %0 = vector.load %arg1[%c0, %c0_0] : memref<8x1xi32, #tpu.memory_space<vmem>>, vector<8x1xi32>
    %c0_1 = arith.constant 0 : index
    %c0_2 = arith.constant 0 : index
    %1 = vector.load %arg2[%c0_1, %c0_2] : memref<8x1xi32, #tpu.memory_space<vmem>>, vector<8x1xi32>
    %c0_3 = arith.constant 0 : index
    %c0_4 = arith.constant 0 : index
    %2 = vector.load %arg3[%c0_3, %c0_4] : memref<128x128xf32, #tpu.memory_space<vmem>>, vector<128x128xf32>
    %3 = tpu.iota {dimensions = array<i32: 1>} : vector<8x128xi32>
    %4 = vector.broadcast %0 : vector<8x1xi32> to vector<8x128xi32>
    %5 = arith.cmpi eq, %3, %4 : vector<8x128xi32>
    %6 = arith.extui %5 : vector<8x128xi1> to vector<8x128xi32>
    %7 = arith.sitofp %6 : vector<8x128xi32> to vector<8x128xf32>
    %cst = arith.constant dense<0.000000e+00> : vector<8x128xf32>
    %8 = tpu.matmul %7, %2, %cst {dimension_numbers = #tpu.dot_dimension_numbers<[1], [0], [0], [1], [0, 0, 1, 1], [], []>, precision = #tpu.contract_precision<fp32>} : vector<8x128xf32>, vector<128x128xf32>, vector<8x128xf32> -> vector<8x128xf32>
    %c0_5 = arith.constant 0 : index
    %c0_6 = arith.constant 0 : index
    %9 = vector.load %arg4[%c0_5, %c0_6] : memref<8x128xf32, #tpu.memory_space<vmem>>, vector<8x128xf32>
    tpu.vector_store %arg4[%c0_5, %c0_6], %8 {strides = array<i32>} : memref<8x128xf32, #tpu.memory_space<vmem>>, vector<8x128xf32>,
    %cst_7 = arith.constant dense<0xFF800000> : vector<8xf32>
    %10 = vector.multi_reduction <maximumf>, %8, %cst_7 [1] : vector<8x128xf32> to vector<8xf32>
    %11 = vector.shape_cast %10 : vector<8xf32> to vector<8x1xf32>
    %12 = vector.broadcast %11 : vector<8x1xf32> to vector<8x128xf32>
    %13 = arith.subf %8, %12 : vector<8x128xf32>
    %14 = math.exp %13 : vector<8x128xf32>
    %cst_8 = arith.constant dense<0.000000e+00> : vector<8xf32>
    %15 = vector.multi_reduction <add>, %14, %cst_8 [1] : vector<8x128xf32> to vector<8xf32>
    %16 = vector.shape_cast %15 : vector<8xf32> to vector<8x1xf32>
    %17 = math.log %16 : vector<8x1xf32>
    %18 = arith.addf %17, %11 : vector<8x1xf32>
    %19 = vector.broadcast %1 : vector<8x1xi32> to vector<8x128xi32>
    %20 = arith.cmpi eq, %3, %19 : vector<8x128xi32>
    %cst_9 = arith.constant 0.000000e+00 : f32
    %21 = vector.broadcast %cst_9 : f32 to vector<8x128xf32>
    %22 = arith.select %20, %8, %21 : vector<8x128xi1>, vector<8x128xf32>
    %cst_10 = arith.constant dense<0.000000e+00> : vector<8xf32>
    %23 = vector.multi_reduction <add>, %22, %cst_10 [1] : vector<8x128xf32> to vector<8xf32>
    %24 = vector.shape_cast %23 : vector<8xf32> to vector<8x1xf32>
    %25 = arith.subf %18, %24 : vector<8x1xf32>
    %c0_11 = arith.constant 0 : index
    %c0_12 = arith.constant 0 : index
    %26 = vector.load %arg5[%c0_11, %c0_12] : memref<8x1xf32, #tpu.memory_space<vmem>>, vector<8x1xf32>
    tpu.vector_store %arg5[%c0_11, %c0_12], %25 {strides = array<i32>} : memref<8x1xf32, #tpu.memory_space<vmem>>, vector<8x1xf32>,
    return
  }
  func.func @transform_0(%arg0: i32) -> (i32, i32) {
    %c0_i32 = arith.constant 0 : i32
    %c0_i32_0 = arith.constant 0 : i32
    return %arg0, %c0_i32 : i32, i32
  }
  func.func @transform_1(%arg0: i32) -> (i32, i32) {
    %c0_i32 = arith.constant 0 : i32
    %c0_i32_0 = arith.constant 0 : i32
    return %arg0, %c0_i32 : i32, i32
  }
  func.func @transform_2(%arg0: i32) -> (i32, i32) {
    %c0_i32 = arith.constant 0 : i32
    %c0_i32_0 = arith.constant 0 : i32
    %c0_i32_1 = arith.constant 0 : i32
    return %c0_i32, %c0_i32_0 : i32, i32
  }
  func.func @transform_3(%arg0: i32) -> (i32, i32) {
    %c0_i32 = arith.constant 0 : i32
    %c0_i32_0 = arith.constant 0 : i32
    return %arg0, %c0_i32 : i32, i32
  }
  func.func @transform_4(%arg0: i32) -> (i32, i32) {
    %c0_i32 = arith.constant 0 : i32
    %c0_i32_0 = arith.constant 0 : i32
    return %arg0, %c0_i32 : i32, i32
  }
}

</mosaic_0001>

<bundles_post_ra>
// kernel: tpu_custom_call.1
= control target key start
LH: loop header
LB: loop body
LE: loop exit
PB: predicated region body
PF: predicated region fallthrough
CT: control target
= control target key end

     0   :  { %10 = vsyncpa [#allocation3], 0  ;;  %s2186_s0 = inlined_call_operand.vmem [shape: s32[16,1], index: 0, kind: input, shape index: {}]   ;;  %s2187_s1 = inlined_call_operand.vmem [shape: s32[16,1], index: 1, kind: input, shape index: {}]   ;;  %s2188_s2 = inlined_call_operand.hbm [shape: f32[128,128], index: 2, kind: input, shape index: {}]   ;;  %s2189_s3 = inlined_call_operand.hbm [shape: f32[16,128], index: 3, kind: output, shape index: {0}]   ;;  %s2190_s4 = inlined_call_operand.vmem [shape: f32[16,1], index: 4, kind: output, shape index: {1}]  }
   0x1   :  { %11 = vsyncpa [#allocation4], 0 }
   0x2   :  { %13 = vsyncpa [#allocation4 + $0x1], 0  ;;  %s1728_s15 = smov 0   ;;  %s1730_s16 = smov 0  }
   0x3   :  { %s1732_s17 = smov 0   ;;  %s1734_s18 = smov 0  }
   0x4 LB: > { %s1749_s19 = sadd.s32 4294967295, %s1692_s18   ;;  %s1052_s20 = sadd.s32 4294967294, %s1692_s18   ;;  %s1692_s18 = sphi %s1734_s18, %s2206_s18   ;;  %s1688_s17 = sphi %s1732_s17, %s2205_s17   ;;  %s1684_s16 = sphi %s1730_s16, %s2204_s16   ;;  %s1680_s15 = sphi %s1728_s15, %s2203_s15  }
   0x5   : > { %s1753_s21 = sadd.s32 1, %s1692_s18   ;;  %s99_s22 = sadd.s32 1, %s1688_s17 }
   0x6   : > { %s96_s23 = ssub.s32 %s1692_s18, %s1753_s21  ;;  %p109_p0 = scmp.ne.s32.totalorder %s1688_s17, %s1684_s16 }
   0x7   : > { %p97_p1 = scmp.eq.s32.totalorder %s96_s23, 0  ;;  %p110_p2 = scmp.eq.s32.totalorder %s1749_s19, 1 }
   0x8   : > { %p115_p3 = scmp.ne.s32.totalorder %s1684_s16, %s1680_s15  ;;  %p116_p4 = scmp.eq.s32.totalorder %s1052_s20, 1 }
   0x9   : > { %s1764_s24 = scalar_select %p97_p1, %s1688_s17, %s99_s22  }
   0xa   : > { %p1766_p5 = por %p110_p2, %p109_p0  ;;  %p1770_p6 = por %p116_p4, %p115_p3 }
   0xb   : > { %p1053_p7 = scmp.ge.s32.totalorder %s1692_s18, 1  ;;  %p149_p8 = scmp.lt.s32.totalorder %s1692_s18, 3 }
   0xc   : > { %s2194_s25 = scalar_select %p1766_p5, 1, 0 }
   0xd   : > { %s2195_s26 = scalar_select %p1770_p6, 1, 0 }
   0xe   : > { %p2191_p9 = scmp.eq.s32.totalorder %s1749_s19, 0  ;;  %p1777_p10 = pnand %p1053_p7, %p149_p8 }
   0xf   : > { %s1694_s28 = smov [#allocation2]   ;;  %s1598_s7 = scalar_lea.hbm %s2188_s2, 2048 }
  0x10   : > { %s2196_s27 = scalar_select %p1777_p10, 1, 0 }
  0x11   : > { %s161_s29 = sshll.u32 %s1694_s28, 4  ;;  %p1541_p11 = pneg %p1777_p10  ;;  %s162_s29 = int_to_ptr.vmem [resolvable:$true] %s161_s29 }
  0x12   : > { %p1599_p13 = scmp.ne.s32.totalorder %s2188_s2, %s1598_s7  ;;  %p1605_p3 = scmp.lt.u32.totalorder %s1598_s7, %s2188_s2 }
  0x13   : > { %p1785_p12 = pnand %p2191_p9, %p1541_p11 }
  0x15   : > { %p1600_p0 = pneg %p1785_p12 }
  0x17   : > { %p1601_p1 = pnand %p1600_p0, %p1599_p13 }
  0x19   : > { %p1602_p2 = pneg %p1601_p1 }
  0x1b   : > { %p1607_p4 = pnand %p1605_p3, %p1602_p2 }
  0x1d   : > { %1610 = shalt.err (!%p1607_p4)
}
  0x1e   : > { %s1611_s12 = scalar_lea.vmem %s162_s29, 2048  ;;  %p1619_p9 = scmp.lt.s32.totalorder %s162_s29, %s162_s29 }
  0x1f   : > { %p1612_p7 = scmp.ne.s32.totalorder %s162_s29, %s1611_s12  ;;  %p1620_p6 = scmp.lt.s32.totalorder %s1611_s12, %s1611_s12 }
  0x21   : > { %p1614_p8 = pnand %p1612_p7, %p1600_p0  ;;  %p1621_p5 = por %p1620_p6, %p1619_p9 }
  0x23   : > { %p1615_p11 = pneg %p1614_p8 }
  0x25   : > { %p1622_p10 = pnand %p1621_p5, %p1615_p11 }
  0x27   : > { %1625 = shalt.err (!%p1622_p10)
}
  0x28   : > { %s1695_s13 = smov 128   ;;  %s1696_s14 = smov 8  }
  0x29   : > { %1544 = dma.hbm_to_vmem [thread:$0]  (!%p1785_p12), %s2188_s2, 2048, %s162_s29, [#allocation3], %s1695_s13, %s1695_s13, %s1696_s14  }
  0x2a   : > { %p2198_p13 = scmp.ne.s32.totalorder %s2196_s27, 0 }
  0x2b   : > { %p2199_p1 = scmp.eq.s32.totalorder (!%p2198_p13), %s1749_s19, 0 }
  0x2c   : > { %191 = sbr.rel (%p2198_p13) target bundleno = 792 (0x318), region = 32 }
  0x33   : > { %1671 = dma.done.wait (%p2199_p1), [#allocation3], 2048   ;;  %p2200_p0 = pmov %p2199_p1 }
  0x34   : > { %p224_p5 = scmp.lt.s32.totalorder %s1749_s19, 1  ;;  %v1697_v0 = vmov 0   ;;  %v1698_v1 = vmov 0.0|0.0   ;;  %v238_v3 = vld [vmem:[#allocation2] sm:$0xff]  ;;  %v239_v4 = vld [vmem:[#allocation2 + $0x8] sm:$0xff]  ;;  %v240_v7 = vld [vmem:[#allocation2 + $0x10] sm:$0xff] }
  0x35   : > { %1673 = vsyncadd (%p2200_p0), [#allocation3], 4294965248  ;;  %1592 = vset.pattern.permute.xlu0 %v1697_v0  ;;  %1454 = vmatprep.subr.bf16.mxu0 %v1698_v1  ;;  %v263_v5 = vand.u32 4294901760, %v238_v3  ;;  %v266_v6 = vand.u32 4294901760, %v239_v4  ;;  %v241_v8 = vld [vmem:[#allocation2 + $0x18] sm:$0xff]  ;;  %v242_v9 = vld [vmem:[#allocation2 + $0x20] sm:$0xff] }
  0x36   : > { %s225_s23 = scalar_select %p224_p5, %s1749_s19, 1  ;;  %1382 = vmatprep.subr.bf16.mxu1 %v1698_v1  ;;  %1593 = vset.pattern.permute.xlu1 %v1697_v0  ;;  %v269_v10 = vand.u32 4294901760, %v240_v7  ;;  %v272_v11 = vand.u32 4294901760, %v241_v8  ;;  %v243_v12 = vld [vmem:[#allocation2 + $0x28] sm:$0xff]  ;;  %v275_v13 = vand.u32 4294901760, %v242_v9  ;;  %v244_v14 = vld [vmem:[#allocation2 + $0x30] sm:$0xff] }
  0x37   : > { %v245_v15 = vld [vmem:[#allocation2 + $0x38] sm:$0xff]  ;;  %v1821_v16 = vpack.c.bf16 %v266_v6, %v263_v5  ;;  %v1823_v17 = vsub.f32 %v238_v3, %v263_v5  ;;  %v1825_v18 = vsub.f32 %v239_v4, %v266_v6  ;;  %v278_v19 = vand.u32 4294901760, %v243_v12  ;;  %v1827_v20 = vld [vmem:[#allocation2 + $0x40] sm:$0xff]  ;;  %v1829_v21 = vld [vmem:[#allocation2 + $0x48] sm:$0xff]  ;;  %s215_s8 = sand.u32 1, %s1684_s16   ;;  %s1067_s11 = sshll.u32 %s1749_s19, 7 }
  0x38   : > { %s1815_s27 = sshll.u32 %s225_s23, 3  ;;  %v1831_v22 = vld [vmem:[#allocation2 + $0x50] sm:$0xff]  ;;  %v1833_v23 = vsub.f32 %v240_v7, %v269_v10  ;;  %v1835_v24 = vsub.f32 %v241_v8, %v272_v11  ;;  %v1837_v25 = vsub.f32 %v242_v9, %v275_v13  ;;  %v1839_v26 = vld [vmem:[#allocation2 + $0x58] sm:$0xff]  ;;  %v1841_v27 = vld [vmem:[#allocation2 + $0x60] sm:$0xff]  ;;  %v1845_v28 = vpack.c.bf16 %v272_v11, %v269_v10  ;;  %s1058_s9 = sshll.u32 %s215_s8, 3 }
  0x39   : > { %s227_s30 = scalar_lea.vmem %s2186_s0, %s1815_s27  ;;  %1456 = vmatpush3.bf16.msra.mxu0 %v1821_v16  ;;  %1384 = vmatpush3.bf16.msra.mxu1 %v1821_v16  ;;  %v1847_v29 = vsub.f32 %v243_v12, %v278_v19  ;;  %v281_v30 = vand.u32 4294901760, %v244_v14  ;;  %v284_v31 = vand.u32 4294901760, %v245_v15  ;;  %v287_v32 = vand.u32 4294901760, %v1827_v20  ;;  %v1854_v35 = vld [vmem:[#allocation2 + $0x68] sm:$0xff]  ;;  %v1862_v40 = vld [vmem:[#allocation2 + $0x70] sm:$0xff]  ;;  %v1864_v41 = vld [vmem:[#allocation2 + $0x78] sm:$0xff]  ;;  %s231_s7 = scalar_lea.vmem %s2187_s1, %s1815_s27 }
  0x3a   : > { %v236_v2 = vld [vmem:[%s227_s30] sm:$0xff]  ;;  %1457 = vmatprep.subr.bf16.mxu0 %v1698_v1  ;;  %1385 = vmatprep.subr.bf16.mxu1 %v1698_v1  ;;  %v290_v33 = vand.u32 4294901760, %v1829_v21  ;;  %v293_v34 = vand.u32 4294901760, %v1831_v22  ;;  %v296_v38 = vand.u32 4294901760, %v1839_v26  ;;  %v299_v39 = vand.u32 4294901760, %v1841_v27  ;;  %s217_s10 = scalar_lea.vmem [#allocation5], %s1058_s9  ;;  %s2146_s20 = scalar_lea.hbm %s2189_s3, %s1067_s11 }
  0x3b   : > { %257 = vperm.xlu0 %1592, %v236_v2   ;;  %v1856_v36 = vsub.f32 %v244_v14, %v281_v30  ;;  %v1858_v37 = vsub.f32 %v245_v15, %v284_v31  ;;  %v1866_v42 = vpack.c.bf16 %v278_v19, %v275_v13  ;;  %v1869_v43 = vsub.f32 %v1827_v20, %v287_v32  ;;  %s942_s12 = sshll.u32 %s217_s10, 4  ;;  %s925_s22 = scalar_lea.sflag [#allocation4], %s215_s8  ;;  %s943_s12 = int_to_ptr.vmem [resolvable:$true] %s942_s12 }
  0x3c   : > { %v1872_v44 = vsub.f32 %v1829_v21, %v290_v33  ;;  %v1879_v45 = vsub.f32 %v1831_v22, %v293_v34  ;;  %v1884_v46 = vsub.f32 %v1839_v26, %v296_v38  ;;  %v302_v47 = vand.u32 4294901760, %v1854_v35  ;;  %s1626_s23 = scalar_lea.vmem %s943_s12, 128  ;;  %p2201_p9 = scmp.ne.s32.totalorder %s2194_s25, 0 }
  0x3d   : > { %1459 = vmatpush3.bf16.msra.mxu0 %v1845_v28  ;;  %1387 = vmatpush3.bf16.msra.mxu1 %v1845_v28  ;;  %v1890_v48 = vsub.f32 %v1841_v27, %v299_v39  ;;  %v305_v49 = vand.u32 4294901760, %v1862_v40  ;;  %v308_v50 = vand.u32 4294901760, %v1864_v41  ;;  %v356_v51 = vand.u32 4294901760, %v1823_v17  ;;  %p1627_p6 = scmp.ne.s32.totalorder %s943_s12, %s1626_s23  ;;  %s1702_s28 = smov [#allocation5]  }
  0x3e   : > { %1460 = vmatprep.subr.bf16.mxu0 %v1698_v1  ;;  %1388 = vmatprep.subr.bf16.mxu1 %v1698_v1  ;;  %v1900_v52 = vsub.f32 %v1854_v35, %v302_v47  ;;  %vm1699_vm0 = vmmov 0   ;;  %v1700_v53 = vmov 0.0   ;;  %v363_v54 = vand.u32 4294901760, %v1825_v18  ;;  %s1630_s29 = sshll.u32 %s1702_s28, 4  ;;  %s1631_s29 = int_to_ptr.vmem [resolvable:$false] %s1630_s29 }
  0x3f   : > { %1309 = vmatprep.mubr.msk.f32.mxu0 %vm1699_vm0, %v1700_v53  ;;  %1204 = vmatprep.mubr.msk.f32.mxu1 %vm1699_vm0, %v1700_v53  ;;  %v370_v55 = vand.u32 4294901760, %v1833_v23  ;;  %v1908_v56 = vpack.c.bf16 %v284_v31, %v281_v30  ;;  %v1913_v57 = vsub.f32 %v1862_v40, %v305_v49  ;;  %v1918_v58 = vsub.f32 %v1864_v41, %v308_v50  ;;  %p1628_p10 = pnand %p1627_p6, %p2201_p9  ;;  %s1632_s30 = scalar_lea.vmem %s1631_s29, 256 }
  0x40   : > { %v357_v59 = vsub.f32 %v1823_v17, %v356_v51  ;;  %v1923_v60 = vpack.c.bf16 %v363_v54, %v356_v51  ;;  %v364_v61 = vsub.f32 %v1825_v18, %v363_v54  ;;  %v377_v62 = vand.u32 4294901760, %v1835_v24  ;;  %p1633_p2 = scmp.lt.s32.totalorder %s943_s12, %s1631_s29  ;;  %p1634_p3 = scmp.lt.s32.totalorder %s1632_s30, %s1626_s23 }
  0x41   : > { %1462 = vmatpush3.bf16.msra.mxu0 %v1866_v42  ;;  %1390 = vmatpush3.bf16.msra.mxu1 %v1866_v42  ;;  %v371_v63 = vsub.f32 %v1833_v23, %v370_v55  ;;  %v384_v2 = vand.u32 4294901760, %v1837_v25  ;;  %v391_v3 = vand.u32 4294901760, %v1847_v29  ;;  %v398_v11 = vand.u32 4294901760, %v1856_v36  ;;  %p1629_p12 = pneg %p1628_p10 }
  0x42   : > { %1463 = vmatprep.subr.bf16.mxu0 %v1698_v1  ;;  %1391 = vmatprep.subr.bf16.mxu1 %v1698_v1  ;;  %v358_v0 = vand.u32 4294901760, %v357_v59  ;;  %v365_v4 = vand.u32 4294901760, %v364_v61  ;;  %v1932_v5 = vpack.c.bf16 %v377_v62, %v370_v55  ;;  %v378_v7 = vsub.f32 %v1835_v24, %v377_v62  ;;  %p1635_p4 = por %p1634_p3, %p1633_p2 }
  0x43   : > { %v372_v6 = vand.u32 4294901760, %v371_v63  ;;  %v1935_v8 = vpack.c.bf16 %v391_v3, %v384_v2  ;;  %v385_v9 = vsub.f32 %v1837_v25, %v384_v2  ;;  %v392_v10 = vsub.f32 %v1847_v29, %v391_v3 }
  0x44   : > { %v1942_v12 = vpack.c.bf16 %v290_v33, %v287_v32  ;;  %v1944_v13 = vpack.c.bf16 %v365_v4, %v358_v0  ;;  %v379_v14 = vand.u32 4294901760, %v378_v7  ;;  %v405_v15 = vand.u32 4294901760, %v1858_v37  ;;  %p1636_p7 = pnand %p1635_p4, %p1629_p12 }
  0x45   : > { %1465 = vmatpush3.bf16.msra.mxu0 %v1908_v56  ;;  %1393 = vmatpush3.bf16.msra.mxu1 %v1908_v56  ;;  %v386_v19 = vand.u32 4294901760, %v385_v9  ;;  %v393_v20 = vand.u32 4294901760, %v392_v10  ;;  %v399_v21 = vsub.f32 %v1856_v36, %v398_v11  ;;  %v412_v54 = vand.u32 4294901760, %v1869_v43 }
  0x46   : > { %1466 = vmatprep.subr.bf16.mxu0 %v1698_v1  ;;  %1394 = vmatprep.subr.bf16.mxu1 %v1698_v1  ;;  %v1950_v30 = vpack.c.bf16 %v379_v14, %v372_v6  ;;  %v1952_v31 = vpack.c.bf16 %v405_v15, %v398_v11  ;;  %v406_v32 = vsub.f32 %v1858_v37, %v405_v15  ;;  %v419_v55 = vand.u32 4294901760, %v1872_v44 }
  0x47   : > { %v1955_v33 = vpack.c.bf16 %v393_v20, %v386_v19  ;;  %v400_v51 = vand.u32 4294901760, %v399_v21  ;;  %v1965_v59 = vpack.c.bf16 %v296_v38, %v293_v34  ;;  %v413_v63 = vsub.f32 %v1869_v43, %v412_v54 }
  0x48   : > { %v407_v61 = vand.u32 4294901760, %v406_v32  ;;  %v1969_v62 = vpack.c.bf16 %v419_v55, %v412_v54  ;;  %v420_v0 = vsub.f32 %v1872_v44, %v419_v55  ;;  %v426_v22 = vand.u32 4294901760, %v1879_v45 }
  0x49   : > { %1468 = vmatpush3.bf16.msra.mxu0 %v1942_v12  ;;  %1396 = vmatpush3.bf16.msra.mxu1 %v1942_v12  ;;  %v414_v3 = vand.u32 4294901760, %v413_v63  ;;  %v433_v26 = vand.u32 4294901760, %v1884_v46  ;;  %v1983_v34 = vpack.c.bf16 %v302_v47, %v299_v39  ;;  %v440_v11 = vand.u32 4294901760, %v1890_v48 }
  0x4a   : > { %1469 = vmatprep.subr.bf16.mxu0 %v1698_v1  ;;  %1397 = vmatprep.subr.bf16.mxu1 %v1698_v1  ;;  %v1973_v2 = vpack.c.bf16 %v407_v61, %v400_v51  ;;  %v421_v4 = vand.u32 4294901760, %v420_v0  ;;  %v427_v7 = vsub.f32 %v1879_v45, %v426_v22  ;;  %v447_v27 = vand.u32 4294901760, %v1900_v52 }
  0x4b   : > { %v1989_v6 = vpack.c.bf16 %v433_v26, %v426_v22  ;;  %v434_v9 = vsub.f32 %v1884_v46, %v433_v26  ;;  %v2001_v35 = vpack.c.bf16 %v308_v50, %v305_v49  ;;  %v441_v14 = vsub.f32 %v1890_v48, %v440_v11 }
  0x4c   : > { %v1987_v38 = vpack.c.bf16 %v421_v4, %v414_v3  ;;  %v428_v10 = vand.u32 4294901760, %v427_v7  ;;  %v2005_v47 = vpack.c.bf16 %v447_v27, %v440_v11  ;;  %v448_v15 = vsub.f32 %v1900_v52, %v447_v27 }
  0x4d   : > { %1471 = vmatpush3.bf16.msra.mxu0 %v1965_v59  ;;  %1399 = vmatpush3.bf16.msra.mxu1 %v1965_v59  ;;  %v435_v39 = vand.u32 4294901760, %v434_v9  ;;  %v442_v20 = vand.u32 4294901760, %v441_v14  ;;  %v454_v40 = vand.u32 4294901760, %v1913_v57  ;;  %v461_v41 = vand.u32 4294901760, %v1918_v58 }
  0x4e   : > { %1472 = vmatprep.subr.bf16.mxu0 %v1698_v1  ;;  %1400 = vmatprep.subr.bf16.mxu1 %v1698_v1  ;;  %v449_v21 = vand.u32 4294901760, %v448_v15  ;;  %v1431_v63 = vpack.c.bf16 %v1825_v18, %v1823_v17  ;;  %v1434_v0 = vpack.c.bf16 %v1835_v24, %v1833_v23  ;;  %v1437_v3 = vpack.c.bf16 %v1847_v29, %v1837_v25  ;;  %v237_v18 = vld [vmem:[%s231_s7] sm:$0xff] }
  0x4f   : > { %v1422_v19 = vpack.c.bf16 %v435_v39, %v428_v10  ;;  %v1500_v50 = vpack.c.bf16 %v461_v41, %v454_v40  ;;  %v455_v32 = vsub.f32 %v1913_v57, %v454_v40  ;;  %v462_v51 = vsub.f32 %v1918_v58, %v461_v41  ;;  %915 = vperm.xlu1 %1593, %v237_v18  }
  0x50   : > { %v1425_v49 = vpack.c.bf16 %v449_v21, %v442_v20  ;;  %v1440_v4 = vpack.c.bf16 %v1858_v37, %v1856_v36  ;;  %v1443_v22 = vpack.c.bf16 %v1872_v44, %v1869_v43  ;;  %v1446_v26 = vpack.c.bf16 %v1884_v46, %v1879_v45 }
  0x51   : > { %1474 = vmatpush3.bf16.msra.mxu0 %v1983_v34  ;;  %1402 = vmatpush3.bf16.msra.mxu1 %v1983_v34  ;;  %v456_v54 = vand.u32 4294901760, %v455_v32  ;;  %v463_v55 = vand.u32 4294901760, %v462_v51  ;;  %v1449_v7 = vpack.c.bf16 %v1900_v52, %v1890_v48  ;;  %v1452_v17 = vpack.c.bf16 %v1918_v58, %v1913_v57 }
  0x52   : > { %1475 = vmatprep.subr.bf16.mxu0 %v1698_v1  ;;  %1403 = vmatprep.subr.bf16.mxu1 %v1698_v1  ;;  %v254_v9 = vlaneseq }
  0x53   : > { %v1428_v61 = vpack.c.bf16 %v463_v55, %v456_v54 }
  0x54   : > { %v2037_v10 = vand.u32 127, %v254_v9 }
  0x55   : > { %1477 = vmatpush3.bf16.msra.mxu0 %v2001_v35  ;;  %1405 = vmatpush3.bf16.msra.mxu1 %v2001_v35 }
  0x56   : > { %1478 = vmatprep.subr.bf16.mxu0 %v1698_v1  ;;  %1406 = vmatprep.subr.bf16.mxu1 %v1698_v1 }
  0xba   : > { %v2039_v11 = vpop.permute.xlu0 %257 }
  0xbb   : > { %vm259_vm1 = vcmp.eq.s32.totalorder %v2037_v10, %v2039_v11 }
  0xbc   : > { %v1062_v27 = vsel %vm259_vm1, 1.0, %v1700_v53 }
  0xbd   : > { %v2047_v39 = vsub.f32 %v1062_v27, %v1062_v27 }
  0xbf   : > { %v345_v14 = vand.u32 4294901760, %v2047_v39 }
  0xc1   : > { %1310 = vmatmul.mubr.f32.vlgmr.msra.gmra.mrb[0].mxu0 %v345_v14  ;;  %v346_v15 = vsub.f32 %v2047_v39, %v345_v14 }
  0xc2   : > { %1480 = vmatpush3.bf16.msra.mxu0 %v1923_v60  ;;  %1344 = vmatprep.mubr.msk.f32.mxu0 %vm1699_vm0, %v1700_v53  ;;  %v1701_v60 = vmov 1.0  }
  0xc3   : > { %1481 = vmatprep.subr.bf16.mxu0 %v1698_v1  ;;  %v347_v20 = vand.u32 4294901760, %v346_v15 }
  0xc5   : > { %1205 = vmatmul.mubr.f32.vlgmr.msra.gmra.mrb[0].mxu1 %v347_v20 }
  0xc6   : > { %1408 = vmatpush3.bf16.msra.mxu1 %v1944_v13  ;;  %1483 = vmatpush3.bf16.msra.mxu0 %v1932_v5 }
  0xc7   : > { %1409 = vmatprep.subr.bf16.mxu1 %v1698_v1  ;;  %1484 = vmatprep.subr.bf16.mxu0 %v1698_v1 }
  0xc8   : > { %1239 = vmatprep.mubr.msk.f32.mxu1 %vm1699_vm0, %v1700_v53 }
  0xca   : > { %1411 = vmatpush3.bf16.msra.mxu1 %v1950_v30  ;;  %1486 = vmatpush3.bf16.msra.mxu0 %v1935_v8 }
  0xcb   : > { %1412 = vmatprep.subr.bf16.mxu1 %v1698_v1  ;;  %1487 = vmatprep.subr.bf16.mxu0 %v1698_v1 }
  0xce   : > { %1414 = vmatpush3.bf16.msra.mxu1 %v1955_v33  ;;  %1489 = vmatpush3.bf16.msra.mxu0 %v1952_v31  ;;  %v916_v25 = vpop.permute.xlu1 %915 }
  0xcf   : > { %1415 = vmatprep.subr.bf16.mxu1 %v1698_v1  ;;  %1490 = vmatprep.subr.bf16.mxu0 %v1698_v1  ;;  %vm917_vm2 = vcmp.eq.s32.totalorder %v2037_v10, %v916_v25 }
  0xd2   : > { %1417 = vmatpush3.bf16.msra.mxu1 %v1973_v2  ;;  %1492 = vmatpush3.bf16.msra.mxu0 %v1969_v62 }
  0xd3   : > { %1418 = vmatprep.subr.bf16.mxu1 %v1698_v1  ;;  %1493 = vmatprep.subr.bf16.mxu0 %v1698_v1 }
  0xd6   : > { %1420 = vmatpush3.bf16.msra.mxu1 %v1987_v38  ;;  %1495 = vmatpush3.bf16.msra.mxu0 %v1989_v6 }
  0xd7   : > { %1421 = vmatprep.subr.bf16.mxu1 %v1698_v1  ;;  %1496 = vmatprep.subr.bf16.mxu0 %v1698_v1 }
  0xda   : > { %1423 = vmatpush3.bf16.msra.mxu1 %v1422_v19  ;;  %1498 = vmatpush3.bf16.msra.mxu0 %v2005_v47 }
  0xdb   : > { %1424 = vmatprep.subr.bf16.mxu1 %v1698_v1  ;;  %1499 = vmatprep.subr.bf16.mxu0 %v1698_v1 }
  0xde   : > { %1426 = vmatpush3.bf16.msra.mxu1 %v1425_v49  ;;  %1501 = vmatpush3.bf16.msra.mxu0 %v1500_v50 }
  0xdf   : > { %1427 = vmatprep.subr.bf16.mxu1 %v1698_v1  ;;  %1502 = vmatprep.subr.bf16.mxu0 %v1698_v1 }
  0xe1   : > { %1345 = vmatmul.mubr.msk.f32.vlgmr.msra.gmra.mrb[0].mxu0 %vm259_vm1, %v1701_v60 }
  0xe2   : > { %1429 = vmatpush3.bf16.msra.mxu1 %v1428_v61  ;;  %1504 = vmatpush3.bf16.msra.mxu0 %v1821_v16 }
  0xe3   : > { %1430 = vmatprep.subr.bf16.mxu1 %v1698_v1  ;;  %1505 = vmatprep.subr.bf16.mxu0 %v1698_v1 }
  0xe4   : > { %1379 = vmatprep.mubr.msk.f32.mxu0 %vm1699_vm0, %v1700_v53 }
  0xe5   : > { %1240 = vmatmul.mubr.msk.f32.vlgmr.msra.gmra.mrb[0].mxu1 %vm259_vm1, %v1701_v60 }
  0xe6   : > { %1432 = vmatpush3.bf16.msra.mxu1 %v1431_v63  ;;  %1507 = vmatpush3.bf16.msra.mxu0 %v1845_v28 }
  0xe7   : > { %1433 = vmatprep.subr.bf16.mxu1 %v1698_v1  ;;  %1508 = vmatprep.subr.bf16.mxu0 %v1698_v1 }
  0xe8   : > { %1274 = vmatprep.mubr.msk.f32.mxu1 %vm1699_vm0, %v1700_v53 }
  0xea   : > { %1435 = vmatpush3.bf16.msra.mxu1 %v1434_v0  ;;  %1510 = vmatpush3.bf16.msra.mxu0 %v1866_v42 }
  0xeb   : > { %1436 = vmatprep.subr.bf16.mxu1 %v1698_v1  ;;  %1511 = vmatprep.subr.bf16.mxu0 %v1698_v1 }
  0xee   : > { %1438 = vmatpush3.bf16.msra.mxu1 %v1437_v3  ;;  %1513 = vmatpush3.bf16.msra.mxu0 %v1908_v56 }
  0xef   : > { %1439 = vmatprep.subr.bf16.mxu1 %v1698_v1  ;;  %1514 = vmatprep.subr.bf16.mxu0 %v1698_v1 }
  0xf2   : > { %1441 = vmatpush3.bf16.msra.mxu1 %v1440_v4  ;;  %1516 = vmatpush3.bf16.msra.mxu0 %v1942_v12 }
  0xf3   : > { %1442 = vmatprep.subr.bf16.mxu1 %v1698_v1  ;;  %1517 = vmatprep.subr.bf16.mxu0 %v1698_v1 }
  0xf6   : > { %1444 = vmatpush3.bf16.msra.mxu1 %v1443_v22  ;;  %1519 = vmatpush3.bf16.msra.mxu0 %v1965_v59 }
  0xf7   : > { %1445 = vmatprep.subr.bf16.mxu1 %v1698_v1  ;;  %1520 = vmatprep.subr.bf16.mxu0 %v1698_v1 }
  0xfa   : > { %1447 = vmatpush3.bf16.msra.mxu1 %v1446_v26  ;;  %1522 = vmatpush3.bf16.msra.mxu0 %v1983_v34 }
  0xfb   : > { %1448 = vmatprep.subr.bf16.mxu1 %v1698_v1  ;;  %1523 = vmatprep.subr.bf16.mxu0 %v1698_v1 }
  0xfe   : > { %1450 = vmatpush3.bf16.msra.mxu1 %v1449_v7  ;;  %1525 = vmatpush3.bf16.msra.mxu0 %v2001_v35 }
  0xff   : > { %1451 = vmatprep.subr.bf16.mxu1 %v1698_v1 }
 0x101   : > { %1380 = vmatmul.mubr.msk.f32.vlgmr.msra.gmra.mrb[0].mxu0 %vm259_vm1, %v1701_v60 }
 0x102   : > { %1453 = vmatpush3.bf16.msra.mxu1 %v1452_v17 }
 0x105   : > { %1275 = vmatmul.mubr.f32.vlgmr.msra.gmra.mrb[0].mxu1 %v2047_v39 }
 0x1d4   : > { %v899_v16 = vpop.f32.mrb[0].mxu0 }
 0x1d5   : > { %v1381_v23 = vpop.f32.mrb[1].mxu0 }
 0x1d8   : > { %v604_v24 = vpop.f32.mrb[0].mxu1 }
 0x1d9   : > { %v1526_v28 = vadd.f32 %v899_v16, %v604_v24  ;;  %v1276_v29 = vpop.f32.mrb[1].mxu1 }
 0x1db   : > { %904 = vmax.xlane.f32.xlu0 %v1526_v28  ;;  %903 = vst [vmem:[%s217_s10] sm:$0xff] %v1526_v28  ;;  %v918_v1 = vsel %vm917_vm2, %v1526_v28, 0.0 }
 0x1df   : > { %919 = vadd.xlane.f32.xlu0 %v918_v1 }
 0x268   : > { %v905_v36 = vpop.xlane.xlu0 %904 }
 0x269   : > { %v906_v37 = vsub.f32 %v1526_v28, %v905_v36 }
 0x26b   : > { %v907_v42 = vmul.f32 1.442695, %v906_v37 }
 0x26d   : > { %1594 = vpow2.f32 %v907_v42 }
 0x277   : > { %v1595_v43 = vpop.eup %1594 }
 0x278   : > { %909 = vadd.xlane.f32.xlu1 %v1595_v43 }
 0x279   : > { %1639 = shalt.err (!%p1636_p7)
}
 0x27a   : > { %s1640_s19 = scalar_lea.hbm %s2146_s20, 128  ;;  %s1644_s7 = scalar_lea.hbm %s2189_s3, 256 }
 0x27b   : > { %p1641_p8 = scmp.ne.s32.totalorder %s2146_s20, %s1640_s19  ;;  %p1645_p1 = scmp.lt.u32.totalorder %s2146_s20, %s2189_s3 }
 0x27c   : > { %p1646_p0 = scmp.lt.u32.totalorder %s1644_s7, %s1640_s19  ;;  %p1648_p6 = scmp.lt.u32.totalorder %s1640_s19, %s2146_s20 }
 0x27d   : > { %p1642_p11 = pnand %p1641_p8, %p2201_p9 }
 0x27e   : > { %p1647_p5 = por %p1646_p0, %p1645_p1 }
 0x27f   : > { %p1643_p13 = pneg %p1642_p11 }
 0x280   : > { %p1649_p10 = por %p1648_p6, %p1647_p5 }
 0x282   : > { %p1650_p12 = pnand %p1649_p10, %p1643_p13 }
 0x284   : > { %1653 = shalt.err (!%p1650_p12)
}
 0x285   : > { %1539 = dma.vmem_to_hbm [thread:$0]  (%p2201_p9), %s943_s12, 128, %s2146_s20, %s925_s22   ;;  %v920_v52 = vpop.xlane.xlu0 %919  ;;  %vm922_vm3 = vcmask 7168  }
 0x286   : > { %s235_s13 = scalar_lea.vmem %s2190_s4, %s1815_s27 }
 0x305   : > { %v910_v44 = vpop.xlane.xlu1 %909 }
 0x306   : > { %1596 = vlog2.f32 %v910_v44 }
 0x310   : > { %v1597_v45 = vpop.eup %1596 }
 0x311   : > { %v912_v46 = vmul.f32 0.6931472, %v1597_v45 }
 0x313   : > { %v913_v48 = vadd.f32 %v912_v46, %v905_v36 }
 0x315   : > { %v921_v53 = vsub.f32 %v913_v48, %v920_v52 }
 0x317   : > { %923 = vst.msk [vmem:[%s235_s13] sm:$0xff] %vm922_vm3, %v921_v53 }
 0x318 PF: > { %p1551_p2 = scmp.ge.s32.totalorder %s1692_s18, 2  ;;  %s957_s25 = sand.u32 1, %s1680_s15  }
 0x319   : > { %p2202_p9 = scmp.ne.s32.totalorder %s2195_s26, 0  ;;  %s958_s12 = scalar_lea.sflag [#allocation4], %s957_s25 }
 0x31b   : > { %p1546_p3 = pnand %p1551_p2, %p2202_p9 }
 0x31d   : > { %1675 = dma.done.wait (!%p1546_p3), %s958_s12, 128  }
 0x31e   : > { %1677 = vsyncadd (!%p1546_p3), %s958_s12, 4294967168  ;;  %p16_p4 = scmp.ge.s32.totalorder %s1753_s21, 4   ;;  %s2203_s15 = smov %s1684_s16 }
 0x31f   : > { %s2204_s16 = smov %s1688_s17  ;;  %s2205_s17 = smov %s1764_s24 }
 0x320   : > { %s2206_s18 = smov %s1753_s21  ;;  %18 = sbr.rel (!%p16_p4) target bundleno = 4 (0x4), region = 87 }
 0x327   :  { %970 = vsyncpa [#allocation3], 1 }
 0x328   :  { %972 = vsyncpa [#allocation3 + $0x1], 1 }
 0x329   :  { %973 = vsyncpa [#allocation4], 1 }
 0x32a   :  { %975 = vsyncpa [#allocation4 + $0x1], 1 }

</bundles_post_ra>
